<compile_context>
chip_gen: v6e
topology: v6e:2x2x1
jax: 0.10.0
libtpu: 0.0.40
codegen_flags: <defaults>
</compile_context>

<pallas_src>
import math
import functools

import jax
import jax.numpy as jnp
from jax.experimental import pallas as pl
from jax.experimental.pallas import tpu as pltpu

# ---- hyperparameters of the synthetic MAE + classification head ----
PATCH = 4          # patch size of the synthetic MAE patch-embed
EMBED_DIM = 32     # "embedding_dim" of ClassificationMAE (small shape for the demo)
MLP_DIM = 64       # hidden dim of the encoder MLP block
N_CLASSES = 10
C_PAD = 128        # class dim zero-padded to a full lane width for a dense store
LN_EPS = 1e-5      # PyTorch nn.LayerNorm default eps

# Row indices inside the packed per-feature vector slab (each row padded to 128 lanes).
(_B_PATCH, _LN1_G, _LN1_B, _B_QKV, _B_O, _LN2_G, _LN2_B,
 _B_MLP1, _B_MLP2, _LNF_G, _LNF_B, _HLN_G, _HLN_B, _H_BIAS) = range(14)
_N_VEC_ROWS = 16   # pad row count to a multiple of 8 sublanes


def _layernorm(x, gamma, beta):
    """PyTorch-style LayerNorm over the last dim (biased variance, eps=1e-5), f32 math.

    Always applied over the TRUE feature width (D=32); padding only exists in the
    head's output columns, never inside an LN reduction.
    """
    mu = jnp.mean(x, axis=-1, keepdims=True)
    var = jnp.mean((x - mu) ** 2, axis=-1, keepdims=True)
    return (x - mu) * jax.lax.rsqrt(var + LN_EPS) * gamma + beta


# -----------------------------------------------------------------------------
# Fused kernel: synthetic mae.forward_encoder_representation + output_head
# -----------------------------------------------------------------------------
# TODO(synk): `mae` is an external module passed to __init__; its exact encoder
# is not specified, so a deterministic 1-block ViT encoder stands in for it.
def fused_mae_cls_kernel(patches_ref, pos_ref, vecs_ref,
                         wp_ref, wqkv_ref, wo_ref, w1_ref, w2_ref, wh_ref,
                         out_ref):
    bm, N, PD = patches_ref.shape
    D, H = EMBED_DIM, MLP_DIM
    scale = 1.0 / math.sqrt(D)

    vecs = vecs_ref[...]                                   # (16, 128) f32, one resident load

    # patch embedding (bf16 MXU, f32 acc) + positional embedding
    p2d = patches_ref[...].reshape(bm * N, PD)             # already bf16 from the wrapper
    x2d = jnp.dot(p2d, wp_ref[...], preferred_element_type=jnp.float32) + vecs[_B_PATCH, :D]
    x = x2d.reshape(bm, N, D) + pos_ref[...][None]

    # --- pre-LN single-head self-attention, fused QKV projection ---
    h = _layernorm(x, vecs[_LN1_G, :D], vecs[_LN1_B, :D])
    h2d = h.reshape(bm * N, D).astype(jnp.bfloat16)
    qkv = jnp.dot(h2d, wqkv_ref[...], preferred_element_type=jnp.float32) + vecs[_B_QKV, :3 * D]
    qkv = qkv.reshape(bm, N, 3 * D).astype(jnp.bfloat16)
    q = qkv[:, :, 0:D]
    k = qkv[:, :, D:2 * D]
    v = qkv[:, :, 2 * D:3 * D]

    s = jnp.einsum('bqd,bkd->bqk', q, k, preferred_element_type=jnp.float32) * scale
    s = s - jnp.max(s, axis=-1, keepdims=True)              # numerically stable softmax
    e = jnp.exp(s)
    attn = e * pl.reciprocal(jnp.sum(e, axis=-1, keepdims=True), approx=True)
    o = jnp.einsum('bqk,bkd->bqd', attn.astype(jnp.bfloat16), v,
                   preferred_element_type=jnp.float32)
    o2d = jnp.dot(o.reshape(bm * N, D).astype(jnp.bfloat16), wo_ref[...],
                  preferred_element_type=jnp.float32) + vecs[_B_O, :D]
    x = x + o2d.reshape(bm, N, D)

    # --- pre-LN MLP block ---
    h = _layernorm(x, vecs[_LN2_G, :D], vecs[_LN2_B, :D])
    m = jnp.dot(h.reshape(bm * N, D).astype(jnp.bfloat16), w1_ref[...],
                preferred_element_type=jnp.float32) + vecs[_B_MLP1, :H]
    m = jax.nn.gelu(m, approximate=True)                     # tanh path -> EUP
    m = jnp.dot(m.astype(jnp.bfloat16), w2_ref[...],
                preferred_element_type=jnp.float32) + vecs[_B_MLP2, :D]
    x = x + m.reshape(bm, N, D)

    # final encoder LN + token mean pool -> (bm, D) representation
    x = _layernorm(x, vecs[_LNF_G, :D], vecs[_LNF_B, :D])
    emb = jnp.mean(x, axis=1)

    # fused classification head: LayerNorm(D) -> Linear(D, C_PAD); lane-dense store.
    embn = _layernorm(emb, vecs[_HLN_G, :D], vecs[_HLN_B, :D])
    out_ref[...] = (jnp.dot(embn.astype(jnp.bfloat16), wh_ref[...],
                            preferred_element_type=jnp.float32) + vecs[_H_BIAS, :])


# -----------------------------------------------------------------------------
# Parameter init (deterministic, synthetic)
# -----------------------------------------------------------------------------
def init_params(key, in_channels, n_tokens):
    PD = in_channels * PATCH * PATCH
    D, H = EMBED_DIM, MLP_DIM

    def nrm(k, shape, std=0.02):
        return std * jax.random.normal(k, shape, dtype=jnp.float32)

    ks = jax.random.split(key, 9)

    pos = nrm(ks[0], (n_tokens, D))                         # positional embedding (f32)

    # packed per-feature vectors (biases / LN gammas / betas), lane-padded to 128
    vecs = jnp.zeros((_N_VEC_ROWS, 128), jnp.float32)
    ones_d = jnp.ones((D,), jnp.float32)
    for row in (_LN1_G, _LN2_G, _LNF_G, _HLN_G):
        vecs = vecs.at[row, :D].set(ones_d)
    # all biases / betas are zero in this synthetic init (rows already zero)

    wp = nrm(ks[1], (PD, D)).astype(jnp.bfloat16)           # patch-embed
    wqkv = jnp.concatenate([nrm(ks[2], (D, D)),
                            nrm(ks[3], (D, D)),
                            nrm(ks[4], (D, D))], axis=1).astype(jnp.bfloat16)
    wo = nrm(ks[5], (D, D)).astype(jnp.bfloat16)
    w1 = nrm(ks[6], (D, H)).astype(jnp.bfloat16)
    w2 = nrm(ks[7], (H, D)).astype(jnp.bfloat16)
    wh = (jnp.zeros((D, C_PAD), jnp.float32)
          .at[:, :N_CLASSES].set(nrm(ks[8], (D, N_CLASSES)))).astype(jnp.bfloat16)

    return (pos, vecs, wp, wqkv, wo, w1, w2, wh)


def _cost_estimate(B, N, PD):
    D, H = EMBED_DIM, MLP_DIM
    flops = (2 * B * N * (PD * D + 3 * D * D + D * D + 2 * D * H)
             + 4 * B * N * N * D                 # attention score + weighted sum
             + 2 * B * D * C_PAD)                # head
    transcendentals = B * N * N + B * N * H + 8 * B * N
    bytes_accessed = (B * N * PD * 2                                   # patches (bf16)
                      + 2 * (PD * D + 3 * D * D + D * D + 2 * D * H + D * C_PAD)  # bf16 weights
                      + (N * D + _N_VEC_ROWS * 128) * 4                # pos + vec slab (f32)
                      + B * C_PAD * 4)                                 # logits out (f32)
    return pl.CostEstimate(flops=flops, transcendentals=transcendentals,
                           bytes_accessed=bytes_accessed)


# -----------------------------------------------------------------------------
# Wrapper
# -----------------------------------------------------------------------------
@functools.partial(jax.jit, static_argnames=("detach",))
def classification_mae_forward(images, params, detach=False):
    # TODO(synk): `detach` (torch.no_grad on the encoder) is autograd-only; forward
    # values are identical, so it is a no-op here with the head fused into the kernel.
    pos, vecs, wp, wqkv, wo, w1, w2, wh = params

    # layout: images NCHW (B, C, H, W); patchify in XLA to (B, N, C*P*P)
    B, C, Himg, Wimg = images.shape
    assert Himg % PATCH == 0 and Wimg % PATCH == 0
    nH, nW = Himg // PATCH, Wimg // PATCH
    N = nH * nW
    PD = C * PATCH * PATCH
    patches = images.reshape(B, C, nH, PATCH, nW, PATCH)
    patches = patches.transpose(0, 2, 4, 1, 3, 5).reshape(B, N, PD)
    # ship the only batch-varying operand in bf16 (it is cast for the MXU anyway)
    patches = patches.astype(jnp.bfloat16)

    # batch tile: whole batch in one step when small, otherwise 32 rows per step
    if B <= 32:
        bm, B_pad = B, B                       # single grid step; block == full array
    else:
        bm = 32                                # multiple of 8 sublanes, pipelined
        B_pad = pl.cdiv(B, bm) * bm
        if B_pad != B:
            patches = jnp.pad(patches, ((0, B_pad - B), (0, 0), (0, 0)))
    nb = B_pad // bm

    bcast = lambda i: (0, 0)   # weights / vectors stay resident across the batch grid
    grid_spec = pltpu.PrefetchScalarGridSpec(
        num_scalar_prefetch=0,
        grid=(nb,),
        in_specs=[
            pl.BlockSpec((bm, N, PD), lambda i: (i, 0, 0)),
            pl.BlockSpec(pos.shape, bcast),
            pl.BlockSpec(vecs.shape, bcast),
            pl.BlockSpec(wp.shape, bcast),
            pl.BlockSpec(wqkv.shape, bcast),
            pl.BlockSpec(wo.shape, bcast),
            pl.BlockSpec(w1.shape, bcast),
            pl.BlockSpec(w2.shape, bcast),
            pl.BlockSpec(wh.shape, bcast),
        ],
        out_specs=pl.BlockSpec((bm, C_PAD), lambda i: (i, 0)),
    )

    logits_padded = pl.pallas_call(
        fused_mae_cls_kernel,
        out_shape=jax.ShapeDtypeStruct((B_pad, C_PAD), jnp.float32),
        grid_spec=grid_spec,
        compiler_params=pltpu.CompilerParams(
            dimension_semantics=("parallel",),         # megacore sharding on v7x
            vmem_limit_bytes=32 * 1024 * 1024,         # safe on v5e/v6e/v7x
        ),
        cost_estimate=_cost_estimate(B_pad, N, PD),
    )(patches, pos, vecs, wp, wqkv, wo, w1, w2, wh)

    return logits_padded[:B, :N_CLASSES]


if __name__ == "__main__":
    key = jax.random.PRNGKey(0)
    kimg, kparam = jax.random.split(key)

    B, C, Himg, Wimg = 2, 4, 16, 16
    images = jax.random.normal(kimg, (B, C, Himg, Wimg), dtype=jnp.float32)

    n_tokens = (Himg // PATCH) * (Wimg // PATCH)
    params = init_params(kparam, C, n_tokens)

    logits = classification_mae_forward(images, params, detach=False)
    jax.block_until_ready(logits)
    assert logits.shape == (B, N_CLASSES)
    assert bool(jnp.all(jnp.isfinite(logits)))
    print("KERNEL_OK")
</pallas_src>

<mosaic_0001>
module attributes {stable_mosaic.version = 11 : i64} {
  func.func @fused_mae_cls_kernel(%arg0: i32, %arg1: memref<2x16x64xbf16, #tpu.memory_space<vmem>>, %arg2: memref<16x32xf32, #tpu.memory_space<vmem>>, %arg3: memref<16x128xf32, #tpu.memory_space<vmem>>, %arg4: memref<64x32xbf16, #tpu.memory_space<vmem>>, %arg5: memref<32x96xbf16, #tpu.memory_space<vmem>>, %arg6: memref<32x32xbf16, #tpu.memory_space<vmem>>, %arg7: memref<32x64xbf16, #tpu.memory_space<vmem>>, %arg8: memref<64x32xbf16, #tpu.memory_space<vmem>>, %arg9: memref<32x128xbf16, #tpu.memory_space<vmem>>, %arg10: memref<2x128xf32, #tpu.memory_space<vmem>>) attributes {dimension_semantics = [#tpu.dimension_semantics<parallel>], iteration_bounds = array<i64: 1>, scalar_prefetch = 0 : i64, scratch_operands = 0 : i64, tpu.core_type = #tpu.core_type<tc>, window_params = [{transform_indices = @transform_0, window_bounds = array<i64: 2, 16, 64>}, {pipeline_mode = #tpu.pipeline_mode<synchronous>, transform_indices = @transform_1, window_bounds = array<i64: 16, 32>}, {pipeline_mode = #tpu.pipeline_mode<synchronous>, transform_indices = @transform_2, window_bounds = array<i64: 16, 128>}, {pipeline_mode = #tpu.pipeline_mode<synchronous>, transform_indices = @transform_3, window_bounds = array<i64: 64, 32>}, {pipeline_mode = #tpu.pipeline_mode<synchronous>, transform_indices = @transform_4, window_bounds = array<i64: 32, 96>}, {pipeline_mode = #tpu.pipeline_mode<synchronous>, transform_indices = @transform_5, window_bounds = array<i64: 32, 32>}, {pipeline_mode = #tpu.pipeline_mode<synchronous>, transform_indices = @transform_6, window_bounds = array<i64: 32, 64>}, {pipeline_mode = #tpu.pipeline_mode<synchronous>, transform_indices = @transform_7, window_bounds = array<i64: 64, 32>}, {pipeline_mode = #tpu.pipeline_mode<synchronous>, transform_indices = @transform_8, window_bounds = array<i64: 32, 128>}, {transform_indices = @transform_9, window_bounds = array<i64: 2, 128>}]} {
    %c0 = arith.constant 0 : index
    %c0_0 = arith.constant 0 : index
    %0 = vector.load %arg3[%c0, %c0_0] : memref<16x128xf32, #tpu.memory_space<vmem>>, vector<16x128xf32>
    %c0_1 = arith.constant 0 : index
    %c0_2 = arith.constant 0 : index
    %c0_3 = arith.constant 0 : index
    %1 = vector.load %arg1[%c0_1, %c0_2, %c0_3] : memref<2x16x64xbf16, #tpu.memory_space<vmem>>, vector<2x16x64xbf16>
    %2 = vector.shape_cast %1 : vector<2x16x64xbf16> to vector<32x64xbf16>
    %c0_4 = arith.constant 0 : index
    %c0_5 = arith.constant 0 : index
    %3 = vector.load %arg4[%c0_4, %c0_5] : memref<64x32xbf16, #tpu.memory_space<vmem>>, vector<64x32xbf16>
    %cst = arith.constant dense<0.000000e+00> : vector<32x32xf32>
    %4 = tpu.matmul %2, %3, %cst {dimension_numbers = #tpu.dot_dimension_numbers<[1], [0], [0], [1], [0, 0, 1, 1], [], []>} : vector<32x64xbf16>, vector<64x32xbf16>, vector<32x32xf32> -> vector<32x32xf32>
    %5 = vector.extract_strided_slice %0 {offsets = [0, 0], sizes = [1, 32], strides = [1, 1]} : vector<16x128xf32> to vector<1x32xf32>
    %6 = vector.shape_cast %5 : vector<1x32xf32> to vector<32xf32>
    %7 = vector.shape_cast %6 : vector<32xf32> to vector<1x32xf32>
    %8 = vector.broadcast %7 : vector<1x32xf32> to vector<32x32xf32>
    %9 = arith.addf %4, %8 : vector<32x32xf32>
    %10 = vector.shape_cast %9 : vector<32x32xf32> to vector<2x16x32xf32>
    %c0_6 = arith.constant 0 : index
    %c0_7 = arith.constant 0 : index
    %11 = vector.load %arg2[%c0_6, %c0_7] : memref<16x32xf32, #tpu.memory_space<vmem>>, vector<16x32xf32>
    %12 = vector.shape_cast %11 : vector<16x32xf32> to vector<1x16x32xf32>
    %13 = vector.broadcast %12 : vector<1x16x32xf32> to vector<2x16x32xf32>
    %14 = arith.addf %10, %13 : vector<2x16x32xf32>
    %15 = vector.extract_strided_slice %0 {offsets = [1, 0], sizes = [1, 32], strides = [1, 1]} : vector<16x128xf32> to vector<1x32xf32>
    %16 = vector.shape_cast %15 : vector<1x32xf32> to vector<32xf32>
    %17 = vector.extract_strided_slice %0 {offsets = [2, 0], sizes = [1, 32], strides = [1, 1]} : vector<16x128xf32> to vector<1x32xf32>
    %18 = vector.shape_cast %17 : vector<1x32xf32> to vector<32xf32>
    %cst_8 = arith.constant dense<0.000000e+00> : vector<2x16xf32>
    %19 = vector.multi_reduction <add>, %14, %cst_8 [2] : vector<2x16x32xf32> to vector<2x16xf32>
    %20 = vector.shape_cast %19 : vector<2x16xf32> to vector<2x16x1xf32>
    %cst_9 = arith.constant 3.200000e+01 : f32
    %21 = vector.broadcast %cst_9 : f32 to vector<2x16x1xf32>
    %22 = arith.divf %20, %21 : vector<2x16x1xf32>
    %23 = vector.broadcast %22 : vector<2x16x1xf32> to vector<2x16x32xf32>
    %24 = arith.subf %14, %23 : vector<2x16x32xf32>
    %25 = arith.mulf %24, %24 : vector<2x16x32xf32>
    %cst_10 = arith.constant dense<0.000000e+00> : vector<2x16xf32>
    %26 = vector.multi_reduction <add>, %25, %cst_10 [2] : vector<2x16x32xf32> to vector<2x16xf32>
    %27 = vector.shape_cast %26 : vector<2x16xf32> to vector<2x16x1xf32>
    %cst_11 = arith.constant 3.200000e+01 : f32
    %28 = vector.broadcast %cst_11 : f32 to vector<2x16x1xf32>
    %29 = arith.divf %27, %28 : vector<2x16x1xf32>
    %30 = vector.broadcast %22 : vector<2x16x1xf32> to vector<2x16x32xf32>
    %31 = arith.subf %14, %30 : vector<2x16x32xf32>
    %cst_12 = arith.constant 9.99999974E-6 : f32
    %32 = vector.broadcast %cst_12 : f32 to vector<2x16x1xf32>
    %33 = arith.addf %29, %32 : vector<2x16x1xf32>
    %34 = math.rsqrt %33 : vector<2x16x1xf32>
    %35 = vector.broadcast %34 : vector<2x16x1xf32> to vector<2x16x32xf32>
    %36 = arith.mulf %31, %35 : vector<2x16x32xf32>
    %37 = vector.shape_cast %16 : vector<32xf32> to vector<1x1x32xf32>
    %38 = vector.broadcast %37 : vector<1x1x32xf32> to vector<2x16x32xf32>
    %39 = arith.mulf %36, %38 : vector<2x16x32xf32>
    %40 = vector.shape_cast %18 : vector<32xf32> to vector<1x1x32xf32>
    %41 = vector.broadcast %40 : vector<1x1x32xf32> to vector<2x16x32xf32>
    %42 = arith.addf %39, %41 : vector<2x16x32xf32>
    %43 = vector.shape_cast %42 : vector<2x16x32xf32> to vector<32x32xf32>
    %44 = arith.truncf %43 : vector<32x32xf32> to vector<32x32xbf16>
    %c0_13 = arith.constant 0 : index
    %c0_14 = arith.constant 0 : index
    %45 = vector.load %arg5[%c0_13, %c0_14] : memref<32x96xbf16, #tpu.memory_space<vmem>>, vector<32x96xbf16>
    %cst_15 = arith.constant dense<0.000000e+00> : vector<32x96xf32>
    %46 = tpu.matmul %44, %45, %cst_15 {dimension_numbers = #tpu.dot_dimension_numbers<[1], [0], [0], [1], [0, 0, 1, 1], [], []>} : vector<32x32xbf16>, vector<32x96xbf16>, vector<32x96xf32> -> vector<32x96xf32>
    %47 = vector.extract_strided_slice %0 {offsets = [3, 0], sizes = [1, 96], strides = [1, 1]} : vector<16x128xf32> to vector<1x96xf32>
    %48 = vector.shape_cast %47 : vector<1x96xf32> to vector<96xf32>
    %49 = vector.shape_cast %48 : vector<96xf32> to vector<1x96xf32>
    %50 = vector.broadcast %49 : vector<1x96xf32> to vector<32x96xf32>
    %51 = arith.addf %46, %50 : vector<32x96xf32>
    %52 = vector.shape_cast %51 : vector<32x96xf32> to vector<2x16x96xf32>
    %53 = arith.truncf %52 : vector<2x16x96xf32> to vector<2x16x96xbf16>
    %54 = vector.extract_strided_slice %53 {offsets = [0, 0, 0], sizes = [2, 16, 32], strides = [1, 1, 1]} : vector<2x16x96xbf16> to vector<2x16x32xbf16>
    %55 = vector.extract_strided_slice %53 {offsets = [0, 0, 32], sizes = [2, 16, 32], strides = [1, 1, 1]} : vector<2x16x96xbf16> to vector<2x16x32xbf16>
    %56 = vector.extract_strided_slice %53 {offsets = [0, 0, 64], sizes = [2, 16, 32], strides = [1, 1, 1]} : vector<2x16x96xbf16> to vector<2x16x32xbf16>
    "tpu.trace_start"() <{level = 10 : i32, message = "bqd,bkd->bqk"}> : () -> ()
    %cst_16 = arith.constant dense<0.000000e+00> : vector<2x16x16xf32>
    %57 = tpu.matmul %54, %55, %cst_16 {dimension_numbers = #tpu.dot_dimension_numbers<[2], [2], [1], [1], [0, 0, 0, 1, 1, 1], [0], [0]>} : vector<2x16x32xbf16>, vector<2x16x32xbf16>, vector<2x16x16xf32> -> vector<2x16x16xf32>
    "tpu.trace_stop"() : () -> ()
    %cst_17 = arith.constant 0.176776692 : f32
    %58 = vector.broadcast %cst_17 : f32 to vector<2x16x16xf32>
    %59 = arith.mulf %57, %58 : vector<2x16x16xf32>
    %cst_18 = arith.constant dense<0xFF800000> : vector<2x16xf32>
    %60 = vector.multi_reduction <maximumf>, %59, %cst_18 [2] : vector<2x16x16xf32> to vector<2x16xf32>
    %61 = vector.shape_cast %60 : vector<2x16xf32> to vector<2x16x1xf32>
    %62 = vector.broadcast %61 : vector<2x16x1xf32> to vector<2x16x16xf32>
    %63 = arith.subf %59, %62 : vector<2x16x16xf32>
    %64 = math.exp %63 : vector<2x16x16xf32>
    %cst_19 = arith.constant dense<0.000000e+00> : vector<2x16xf32>
    %65 = vector.multi_reduction <add>, %64, %cst_19 [2] : vector<2x16x16xf32> to vector<2x16xf32>
    %66 = vector.shape_cast %65 : vector<2x16xf32> to vector<2x16x1xf32>
    %67 = tpu.reciprocal %66 {approx = true} : vector<2x16x1xf32> -> vector<2x16x1xf32>
    %68 = vector.broadcast %67 : vector<2x16x1xf32> to vector<2x16x16xf32>
    %69 = arith.mulf %64, %68 : vector<2x16x16xf32>
    %70 = arith.truncf %69 : vector<2x16x16xf32> to vector<2x16x16xbf16>
    "tpu.trace_start"() <{level = 10 : i32, message = "bqk,bkd->bqd"}> : () -> ()
    %cst_20 = arith.constant dense<0.000000e+00> : vector<2x16x32xf32>
    %71 = tpu.matmul %70, %56, %cst_20 {dimension_numbers = #tpu.dot_dimension_numbers<[2], [1], [1], [2], [0, 0, 0, 1, 1, 2], [0], [0]>} : vector<2x16x16xbf16>, vector<2x16x32xbf16>, vector<2x16x32xf32> -> vector<2x16x32xf32>
    "tpu.trace_stop"() : () -> ()
    %72 = vector.shape_cast %71 : vector<2x16x32xf32> to vector<32x32xf32>
    %73 = arith.truncf %72 : vector<32x32xf32> to vector<32x32xbf16>
    %c0_21 = arith.constant 0 : index
    %c0_22 = arith.constant 0 : index
    %74 = vector.load %arg6[%c0_21, %c0_22] : memref<32x32xbf16, #tpu.memory_space<vmem>>, vector<32x32xbf16>
    %cst_23 = arith.constant dense<0.000000e+00> : vector<32x32xf32>
    %75 = tpu.matmul %73, %74, %cst_23 {dimension_numbers = #tpu.dot_dimension_numbers<[1], [0], [0], [1], [0, 0, 1, 1], [], []>} : vector<32x32xbf16>, vector<32x32xbf16>, vector<32x32xf32> -> vector<32x32xf32>
    %76 = vector.extract_strided_slice %0 {offsets = [4, 0], sizes = [1, 32], strides = [1, 1]} : vector<16x128xf32> to vector<1x32xf32>
    %77 = vector.shape_cast %76 : vector<1x32xf32> to vector<32xf32>
    %78 = vector.shape_cast %77 : vector<32xf32> to vector<1x32xf32>
    %79 = vector.broadcast %78 : vector<1x32xf32> to vector<32x32xf32>
    %80 = arith.addf %75, %79 : vector<32x32xf32>
    %81 = vector.shape_cast %80 : vector<32x32xf32> to vector<2x16x32xf32>
    %82 = arith.addf %14, %81 : vector<2x16x32xf32>
    %83 = vector.extract_strided_slice %0 {offsets = [5, 0], sizes = [1, 32], strides = [1, 1]} : vector<16x128xf32> to vector<1x32xf32>
    %84 = vector.shape_cast %83 : vector<1x32xf32> to vector<32xf32>
    %85 = vector.extract_strided_slice %0 {offsets = [6, 0], sizes = [1, 32], strides = [1, 1]} : vector<16x128xf32> to vector<1x32xf32>
    %86 = vector.shape_cast %85 : vector<1x32xf32> to vector<32xf32>
    %cst_24 = arith.constant dense<0.000000e+00> : vector<2x16xf32>
    %87 = vector.multi_reduction <add>, %82, %cst_24 [2] : vector<2x16x32xf32> to vector<2x16xf32>
    %88 = vector.shape_cast %87 : vector<2x16xf32> to vector<2x16x1xf32>
    %cst_25 = arith.constant 3.200000e+01 : f32
    %89 = vector.broadcast %cst_25 : f32 to vector<2x16x1xf32>
    %90 = arith.divf %88, %89 : vector<2x16x1xf32>
    %91 = vector.broadcast %90 : vector<2x16x1xf32> to vector<2x16x32xf32>
    %92 = arith.subf %82, %91 : vector<2x16x32xf32>
    %93 = arith.mulf %92, %92 : vector<2x16x32xf32>
    %cst_26 = arith.constant dense<0.000000e+00> : vector<2x16xf32>
    %94 = vector.multi_reduction <add>, %93, %cst_26 [2] : vector<2x16x32xf32> to vector<2x16xf32>
    %95 = vector.shape_cast %94 : vector<2x16xf32> to vector<2x16x1xf32>
    %cst_27 = arith.constant 3.200000e+01 : f32
    %96 = vector.broadcast %cst_27 : f32 to vector<2x16x1xf32>
    %97 = arith.divf %95, %96 : vector<2x16x1xf32>
    %98 = vector.broadcast %90 : vector<2x16x1xf32> to vector<2x16x32xf32>
    %99 = arith.subf %82, %98 : vector<2x16x32xf32>
    %cst_28 = arith.constant 9.99999974E-6 : f32
    %100 = vector.broadcast %cst_28 : f32 to vector<2x16x1xf32>
    %101 = arith.addf %97, %100 : vector<2x16x1xf32>
    %102 = math.rsqrt %101 : vector<2x16x1xf32>
    %103 = vector.broadcast %102 : vector<2x16x1xf32> to vector<2x16x32xf32>
    %104 = arith.mulf %99, %103 : vector<2x16x32xf32>
    %105 = vector.shape_cast %84 : vector<32xf32> to vector<1x1x32xf32>
    %106 = vector.broadcast %105 : vector<1x1x32xf32> to vector<2x16x32xf32>
    %107 = arith.mulf %104, %106 : vector<2x16x32xf32>
    %108 = vector.shape_cast %86 : vector<32xf32> to vector<1x1x32xf32>
    %109 = vector.broadcast %108 : vector<1x1x32xf32> to vector<2x16x32xf32>
    %110 = arith.addf %107, %109 : vector<2x16x32xf32>
    %111 = vector.shape_cast %110 : vector<2x16x32xf32> to vector<32x32xf32>
    %112 = arith.truncf %111 : vector<32x32xf32> to vector<32x32xbf16>
    %c0_29 = arith.constant 0 : index
    %c0_30 = arith.constant 0 : index
    %113 = vector.load %arg7[%c0_29, %c0_30] : memref<32x64xbf16, #tpu.memory_space<vmem>>, vector<32x64xbf16>
    %cst_31 = arith.constant dense<0.000000e+00> : vector<32x64xf32>
    %114 = tpu.matmul %112, %113, %cst_31 {dimension_numbers = #tpu.dot_dimension_numbers<[1], [0], [0], [1], [0, 0, 1, 1], [], []>} : vector<32x32xbf16>, vector<32x64xbf16>, vector<32x64xf32> -> vector<32x64xf32>
    %115 = vector.extract_strided_slice %0 {offsets = [7, 0], sizes = [1, 64], strides = [1, 1]} : vector<16x128xf32> to vector<1x64xf32>
    %116 = vector.shape_cast %115 : vector<1x64xf32> to vector<64xf32>
    %117 = vector.shape_cast %116 : vector<64xf32> to vector<1x64xf32>
    %118 = vector.broadcast %117 : vector<1x64xf32> to vector<32x64xf32>
    %119 = arith.addf %114, %118 : vector<32x64xf32>
    %120 = arith.mulf %119, %119 : vector<32x64xf32>
    %121 = arith.mulf %119, %120 : vector<32x64xf32>
    %cst_32 = arith.constant 4.471500e-02 : f32
    %122 = vector.broadcast %cst_32 : f32 to vector<32x64xf32>
    %123 = arith.mulf %122, %121 : vector<32x64xf32>
    %124 = arith.addf %119, %123 : vector<32x64xf32>
    %cst_33 = arith.constant 0.797884583 : f32
    %125 = vector.broadcast %cst_33 : f32 to vector<32x64xf32>
    %126 = arith.mulf %125, %124 : vector<32x64xf32>
    %127 = math.tanh %126 : vector<32x64xf32>
    %cst_34 = arith.constant 1.000000e+00 : f32
    %128 = vector.broadcast %cst_34 : f32 to vector<32x64xf32>
    %129 = arith.addf %128, %127 : vector<32x64xf32>
    %cst_35 = arith.constant 5.000000e-01 : f32
    %130 = vector.broadcast %cst_35 : f32 to vector<32x64xf32>
    %131 = arith.mulf %130, %129 : vector<32x64xf32>
    %132 = arith.mulf %119, %131 : vector<32x64xf32>
    %133 = arith.truncf %132 : vector<32x64xf32> to vector<32x64xbf16>
    %c0_36 = arith.constant 0 : index
    %c0_37 = arith.constant 0 : index
    %134 = vector.load %arg8[%c0_36, %c0_37] : memref<64x32xbf16, #tpu.memory_space<vmem>>, vector<64x32xbf16>
    %cst_38 = arith.constant dense<0.000000e+00> : vector<32x32xf32>
    %135 = tpu.matmul %133, %134, %cst_38 {dimension_numbers = #tpu.dot_dimension_numbers<[1], [0], [0], [1], [0, 0, 1, 1], [], []>} : vector<32x64xbf16>, vector<64x32xbf16>, vector<32x32xf32> -> vector<32x32xf32>
    %136 = vector.extract_strided_slice %0 {offsets = [8, 0], sizes = [1, 32], strides = [1, 1]} : vector<16x128xf32> to vector<1x32xf32>
    %137 = vector.shape_cast %136 : vector<1x32xf32> to vector<32xf32>
    %138 = vector.shape_cast %137 : vector<32xf32> to vector<1x32xf32>
    %139 = vector.broadcast %138 : vector<1x32xf32> to vector<32x32xf32>
    %140 = arith.addf %135, %139 : vector<32x32xf32>
    %141 = vector.shape_cast %140 : vector<32x32xf32> to vector<2x16x32xf32>
    %142 = arith.addf %82, %141 : vector<2x16x32xf32>
    %143 = vector.extract_strided_slice %0 {offsets = [9, 0], sizes = [1, 32], strides = [1, 1]} : vector<16x128xf32> to vector<1x32xf32>
    %144 = vector.shape_cast %143 : vector<1x32xf32> to vector<32xf32>
    %145 = vector.extract_strided_slice %0 {offsets = [10, 0], sizes = [1, 32], strides = [1, 1]} : vector<16x128xf32> to vector<1x32xf32>
    %146 = vector.shape_cast %145 : vector<1x32xf32> to vector<32xf32>
    %cst_39 = arith.constant dense<0.000000e+00> : vector<2x16xf32>
    %147 = vector.multi_reduction <add>, %142, %cst_39 [2] : vector<2x16x32xf32> to vector<2x16xf32>
    %148 = vector.shape_cast %147 : vector<2x16xf32> to vector<2x16x1xf32>
    %cst_40 = arith.constant 3.200000e+01 : f32
    %149 = vector.broadcast %cst_40 : f32 to vector<2x16x1xf32>
    %150 = arith.divf %148, %149 : vector<2x16x1xf32>
    %151 = vector.broadcast %150 : vector<2x16x1xf32> to vector<2x16x32xf32>
    %152 = arith.subf %142, %151 : vector<2x16x32xf32>
    %153 = arith.mulf %152, %152 : vector<2x16x32xf32>
    %cst_41 = arith.constant dense<0.000000e+00> : vector<2x16xf32>
    %154 = vector.multi_reduction <add>, %153, %cst_41 [2] : vector<2x16x32xf32> to vector<2x16xf32>
    %155 = vector.shape_cast %154 : vector<2x16xf32> to vector<2x16x1xf32>
    %cst_42 = arith.constant 3.200000e+01 : f32
    %156 = vector.broadcast %cst_42 : f32 to vector<2x16x1xf32>
    %157 = arith.divf %155, %156 : vector<2x16x1xf32>
    %158 = vector.broadcast %150 : vector<2x16x1xf32> to vector<2x16x32xf32>
    %159 = arith.subf %142, %158 : vector<2x16x32xf32>
    %cst_43 = arith.constant 9.99999974E-6 : f32
    %160 = vector.broadcast %cst_43 : f32 to vector<2x16x1xf32>
    %161 = arith.addf %157, %160 : vector<2x16x1xf32>
    %162 = math.rsqrt %161 : vector<2x16x1xf32>
    %163 = vector.broadcast %162 : vector<2x16x1xf32> to vector<2x16x32xf32>
    %164 = arith.mulf %159, %163 : vector<2x16x32xf32>
    %165 = vector.shape_cast %144 : vector<32xf32> to vector<1x1x32xf32>
    %166 = vector.broadcast %165 : vector<1x1x32xf32> to vector<2x16x32xf32>
    %167 = arith.mulf %164, %166 : vector<2x16x32xf32>
    %168 = vector.shape_cast %146 : vector<32xf32> to vector<1x1x32xf32>
    %169 = vector.broadcast %168 : vector<1x1x32xf32> to vector<2x16x32xf32>
    %170 = arith.addf %167, %169 : vector<2x16x32xf32>
    %cst_44 = arith.constant dense<0.000000e+00> : vector<2x32xf32>
    %171 = vector.multi_reduction <add>, %170, %cst_44 [1] : vector<2x16x32xf32> to vector<2x32xf32>
    %cst_45 = arith.constant 1.600000e+01 : f32
    %172 = vector.broadcast %cst_45 : f32 to vector<2x32xf32>
    %173 = arith.divf %171, %172 : vector<2x32xf32>
    %174 = vector.extract_strided_slice %0 {offsets = [11, 0], sizes = [1, 32], strides = [1, 1]} : vector<16x128xf32> to vector<1x32xf32>
    %175 = vector.shape_cast %174 : vector<1x32xf32> to vector<32xf32>
    %176 = vector.extract_strided_slice %0 {offsets = [12, 0], sizes = [1, 32], strides = [1, 1]} : vector<16x128xf32> to vector<1x32xf32>
    %177 = vector.shape_cast %176 : vector<1x32xf32> to vector<32xf32>
    %cst_46 = arith.constant dense<0.000000e+00> : vector<2xf32>
    %178 = vector.multi_reduction <add>, %173, %cst_46 [1] : vector<2x32xf32> to vector<2xf32>
    %179 = vector.shape_cast %178 : vector<2xf32> to vector<2x1xf32>
    %cst_47 = arith.constant 3.200000e+01 : f32
    %180 = vector.broadcast %cst_47 : f32 to vector<2x1xf32>
    %181 = arith.divf %179, %180 : vector<2x1xf32>
    %182 = vector.broadcast %181 : vector<2x1xf32> to vector<2x32xf32>
    %183 = arith.subf %173, %182 : vector<2x32xf32>
    %184 = arith.mulf %183, %183 : vector<2x32xf32>
    %cst_48 = arith.constant dense<0.000000e+00> : vector<2xf32>
    %185 = vector.multi_reduction <add>, %184, %cst_48 [1] : vector<2x32xf32> to vector<2xf32>
    %186 = vector.shape_cast %185 : vector<2xf32> to vector<2x1xf32>
    %cst_49 = arith.constant 3.200000e+01 : f32
    %187 = vector.broadcast %cst_49 : f32 to vector<2x1xf32>
    %188 = arith.divf %186, %187 : vector<2x1xf32>
    %189 = vector.broadcast %181 : vector<2x1xf32> to vector<2x32xf32>
    %190 = arith.subf %173, %189 : vector<2x32xf32>
    %cst_50 = arith.constant 9.99999974E-6 : f32
    %191 = vector.broadcast %cst_50 : f32 to vector<2x1xf32>
    %192 = arith.addf %188, %191 : vector<2x1xf32>
    %193 = math.rsqrt %192 : vector<2x1xf32>
    %194 = vector.broadcast %193 : vector<2x1xf32> to vector<2x32xf32>
    %195 = arith.mulf %190, %194 : vector<2x32xf32>
    %196 = vector.shape_cast %175 : vector<32xf32> to vector<1x32xf32>
    %197 = vector.broadcast %196 : vector<1x32xf32> to vector<2x32xf32>
    %198 = arith.mulf %195, %197 : vector<2x32xf32>
    %199 = vector.shape_cast %177 : vector<32xf32> to vector<1x32xf32>
    %200 = vector.broadcast %199 : vector<1x32xf32> to vector<2x32xf32>
    %201 = arith.addf %198, %200 : vector<2x32xf32>
    %202 = arith.truncf %201 : vector<2x32xf32> to vector<2x32xbf16>
    %c0_51 = arith.constant 0 : index
    %c0_52 = arith.constant 0 : index
    %203 = vector.load %arg9[%c0_51, %c0_52] : memref<32x128xbf16, #tpu.memory_space<vmem>>, vector<32x128xbf16>
    %cst_53 = arith.constant dense<0.000000e+00> : vector<2x128xf32>
    %204 = tpu.matmul %202, %203, %cst_53 {dimension_numbers = #tpu.dot_dimension_numbers<[1], [0], [0], [1], [0, 0, 1, 1], [], []>} : vector<2x32xbf16>, vector<32x128xbf16>, vector<2x128xf32> -> vector<2x128xf32>
    %205 = vector.extract_strided_slice %0 {offsets = [13, 0], sizes = [1, 128], strides = [1, 1]} : vector<16x128xf32> to vector<1x128xf32>
    %206 = vector.shape_cast %205 : vector<1x128xf32> to vector<128xf32>
    %207 = vector.shape_cast %206 : vector<128xf32> to vector<1x128xf32>
    %208 = vector.broadcast %207 : vector<1x128xf32> to vector<2x128xf32>
    %209 = arith.addf %204, %208 : vector<2x128xf32>
    %c0_54 = arith.constant 0 : index
    %c0_55 = arith.constant 0 : index
    %210 = vector.load %arg10[%c0_54, %c0_55] : memref<2x128xf32, #tpu.memory_space<vmem>>, vector<2x128xf32>
    tpu.vector_store %arg10[%c0_54, %c0_55], %209 {strides = array<i32>} : memref<2x128xf32, #tpu.memory_space<vmem>>, vector<2x128xf32>,
    return
  }
  func.func @transform_0(%arg0: i32) -> (i32, i32, i32) {
    %c0_i32 = arith.constant 0 : i32
    %c0_i32_0 = arith.constant 0 : i32
    %c0_i32_1 = arith.constant 0 : i32
    return %arg0, %c0_i32, %c0_i32_0 : i32, i32, i32
  }
  func.func @transform_1(%arg0: i32) -> (i32, i32) {
    %c0_i32 = arith.constant 0 : i32
    %c0_i32_0 = arith.constant 0 : i32
    %c0_i32_1 = arith.constant 0 : i32
    return %c0_i32, %c0_i32_0 : i32, i32
  }
  func.func @transform_2(%arg0: i32) -> (i32, i32) {
    %c0_i32 = arith.constant 0 : i32
    %c0_i32_0 = arith.constant 0 : i32
    %c0_i32_1 = arith.constant 0 : i32
    return %c0_i32, %c0_i32_0 : i32, i32
  }
  func.func @transform_3(%arg0: i32) -> (i32, i32) {
    %c0_i32 = arith.constant 0 : i32
    %c0_i32_0 = arith.constant 0 : i32
    %c0_i32_1 = arith.constant 0 : i32
    return %c0_i32, %c0_i32_0 : i32, i32
  }
  func.func @transform_4(%arg0: i32) -> (i32, i32) {
    %c0_i32 = arith.constant 0 : i32
    %c0_i32_0 = arith.constant 0 : i32
    %c0_i32_1 = arith.constant 0 : i32
    return %c0_i32, %c0_i32_0 : i32, i32
  }
  func.func @transform_5(%arg0: i32) -> (i32, i32) {
    %c0_i32 = arith.constant 0 : i32
    %c0_i32_0 = arith.constant 0 : i32
    %c0_i32_1 = arith.constant 0 : i32
    return %c0_i32, %c0_i32_0 : i32, i32
  }
  func.func @transform_6(%arg0: i32) -> (i32, i32) {
    %c0_i32 = arith.constant 0 : i32
    %c0_i32_0 = arith.constant 0 : i32
    %c0_i32_1 = arith.constant 0 : i32
    return %c0_i32, %c0_i32_0 : i32, i32
  }
  func.func @transform_7(%arg0: i32) -> (i32, i32) {
    %c0_i32 = arith.constant 0 : i32
    %c0_i32_0 = arith.constant 0 : i32
    %c0_i32_1 = arith.constant 0 : i32
    return %c0_i32, %c0_i32_0 : i32, i32
  }
  func.func @transform_8(%arg0: i32) -> (i32, i32) {
    %c0_i32 = arith.constant 0 : i32
    %c0_i32_0 = arith.constant 0 : i32
    %c0_i32_1 = arith.constant 0 : i32
    return %c0_i32, %c0_i32_0 : i32, i32
  }
  func.func @transform_9(%arg0: i32) -> (i32, i32) {
    %c0_i32 = arith.constant 0 : i32
    %c0_i32_0 = arith.constant 0 : i32
    return %arg0, %c0_i32 : i32, i32
  }
}

</mosaic_0001>

<bundles_post_ra>
// kernel: classification_mae_forward.1
= control target key start
LH: loop header
LB: loop body
LE: loop exit
PB: predicated region body
PF: predicated region fallthrough
CT: control target
= control target key end

     0   :  { %vm86_vm0 = vcmask 523264   ;;  %s1665_s0 = inlined_call_operand.vmem [shape: bf16[2,16,64], index: 0, kind: input, shape index: {}]   ;;  %s1666_s1 = inlined_call_operand.vmem [shape: f32[16,32], index: 1, kind: input, shape index: {}]   ;;  %s1667_s2 = inlined_call_operand.vmem [shape: f32[16,128], index: 2, kind: input, shape index: {}]   ;;  %s1668_s3 = inlined_call_operand.vmem [shape: bf16[64,32], index: 3, kind: input, shape index: {}]   ;;  %s1669_s4 = inlined_call_operand.vmem [shape: bf16[32,96], index: 4, kind: input, shape index: {}]   ;;  %s1670_s5 = inlined_call_operand.vmem [shape: bf16[32,32], index: 5, kind: input, shape index: {}]   ;;  %s1671_s6 = inlined_call_operand.vmem [shape: bf16[32,64], index: 6, kind: input, shape index: {}]   ;;  %s1672_s7 = inlined_call_operand.vmem [shape: bf16[64,32], index: 7, kind: input, shape index: {}]   ;;  %s1673_s8 = inlined_call_operand.vmem [shape: bf16[32,128], index: 8, kind: input, shape index: {}]   ;;  %s1674_s9 = inlined_call_operand.hbm [shape: f32[2,128], index: 9, kind: output, shape index: {}]  }
   0x1   :  { %v1277_v0 = vld [vmem:[%s1668_s3 + $0x18] sm:$0xff]   ;;  %v1278_v1 = vld [vmem:[%s1668_s3 + $0x10] sm:$0xff]   ;;  %v1279_v2 = vld [vmem:[%s1668_s3 + $0x8] sm:$0xff]  }
   0x2   :  { %1192 = vmatprep.subr.bf16.mxu0 %v1277_v0  ;;  %v1281_v3 = vld [vmem:[%s1665_s0] sm:$0xff]   ;;  %v1282_v5 = vld [vmem:[%s1665_s0 + $0x8] sm:$0xff]  }
   0x3   :  { %1193 = vmatpush3.bf16.msra.mxu0 %v1277_v0  ;;  %v1280_v4 = vld [vmem:[%s1668_s3] sm:$0xff]   ;;  %1200 = vmatprep.mubr.msk.bf16.mxu0 %vm86_vm0, %v1281_v3 }
   0x4   :  { %1194 = vmatprep.subr.bf16.mxu0 %v1278_v1 }
   0x7   :  { %1195 = vmatpush3.bf16.msra.mxu0 %v1278_v1 }
   0x8   :  { %1196 = vmatprep.subr.bf16.mxu0 %v1279_v2 }
   0xb   :  { %1197 = vmatpush3.bf16.msra.mxu0 %v1279_v2 }
   0xc   :  { %1198 = vmatprep.subr.bf16.mxu0 %v1280_v4 }
   0xd   :  { %14 = vsyncpa [#allocation3], 0  ;;  %v48_v6 = vlaneseq  ;;  %v1448_v9 = vld [vmem:[%s1667_s2] sm:$0xff]  ;;  %vm148_vm1 = vcmask 261120   ;;  %v143_v18 = vld [vmem:[%s1666_s1 + $0x8] sm:$0xff]  ;;  %vm1368_vm2 = vmmov 0  }
   0xe   :  { %v142_v12 = vld [vmem:[%s1666_s1] sm:$0xff]  ;;  %v1283_v49 = vld [vmem:[%s1669_s4 + $0x8] sm:$0xff]   ;;  %vm401_vm3 = vcmask 130048   ;;  %s1370_s28 = smov 64   ;;  %vm992_vm4 = vcmask 1041409   ;;  %vm995_vm5 = vcmask 254976  }
   0xf   :  { %1199 = vmatpush3.bf16.msra.mxu0 %v1280_v4  ;;  %v1442_v7 = vshrl.u32 %v48_v6, 7  ;;  %v1284_v50 = vld [vmem:[%s1669_s4] sm:$0xff]   ;;  %1204 = vmatprep.subr.bf16.mxu1 %v1283_v49  ;;  %s1369_s4 = smov 96  }
  0x10   :  { %1205 = vmatpush3.bf16.msra.mxu1 %v1283_v49 }
  0x11   :  { %v50_v8 = vsub.s32 0, %v1442_v7  ;;  %1206 = vmatprep.subr.bf16.mxu1 %v1284_v50  ;;  %v204_v63 = vsub.s32 1, %v1442_v7  ;;  %v212_v3 = vsub.s32 2, %v1442_v7 }
  0x12   :  { %1201 = vmatmul.mubr.msk.bf16.vlgmr.msra.gmra.mxu0 %vm86_vm0, %v1282_v5 }
  0x13   :  { %v51_v10 = vrot.slane %v1448_v9, %v50_v8  ;;  %v205_v2 = vrot.slane %v1448_v9, %v204_v63 }
  0x14   :  { %1207 = vmatpush3.bf16.msra.mxu1 %v1284_v50 }
  0xd2   :  { %v1202_v11 = vpop.f32.mrf.mxu0 }
  0xd3   :  { %v136_v13 = vadd.f32 %v1202_v11, %v51_v10  ;;  %v213_v11 = vrot.slane %v1448_v9, %v212_v3 }
  0xd4   :  { %v127_v14 = vpop.f32.mrf.mxu0 }
  0xd5   :  { %v1456_v15 = vadd.f32 %v142_v12, %v136_v13  ;;  %v128_v16 = vadd.f32 %v127_v14, %v51_v10 }
  0xd6   :  { %v1203_v17 = vpop.f32.mrf.mxu0 }
  0xd7   :  { %v1461_v19 = vadd.f32 %v142_v12, %v128_v16  ;;  %v139_v20 = vadd.f32 %v1203_v17, %v51_v10  ;;  %v155_v21 = vsel %vm148_vm1, %v1456_v15, 0.0 }
  0xd8   :  { %v130_v22 = vpop.f32.mrf.mxu0  ;;  %156 = vadd.xlane.f32.xlu1 %v155_v21 }
  0xd9   :  { %v1465_v23 = vadd.f32 %v143_v18, %v139_v20  ;;  %v131_v24 = vadd.f32 %v130_v22, %v51_v10  ;;  %v149_v25 = vsel %vm148_vm1, %v1461_v19, 0.0 }
  0xda   :  { %150 = vadd.xlane.f32.xlu0 %v149_v25 }
  0xdb   :  { %v1469_v26 = vadd.f32 %v143_v18, %v131_v24  ;;  %v158_v27 = vsel %vm148_vm1, %v1465_v23, 0.0 }
  0xdc   :  { %159 = vadd.xlane.f32.xlu1 %v158_v27 }
  0xdd   :  { %v152_v28 = vsel %vm148_vm1, %v1469_v26, 0.0 }
  0xde   :  { %153 = vadd.xlane.f32.xlu0 %v152_v28  ;;  %v226_v28 = vsub.s32 3, %v1442_v7 }
 0x161   :  { %v157_v29 = vpop.xlane.xlu1 %156 }
 0x162   :  { %v164_v30 = vmul.f32 0.03125, %v157_v29  ;;  %v1367_v29 = vmov 0.0  }
 0x163   :  { %v151_v31 = vpop.xlane.xlu0 %150  ;;  %1218 = vmatprep.subr.bf16.mxu0 %v1367_v29  ;;  %1212 = vmatprep.subr.bf16.mxu1 %v1367_v29 }
 0x164   :  { %v162_v32 = vmul.f32 0.03125, %v151_v31  ;;  %v168_v34 = vsub.f32 %v1456_v15, %v164_v30  ;;  %1220 = vmatprep.mubr.msk.bf16.mxu0 %vm1368_vm2, %v1367_v29  ;;  %v227_v31 = vrot.slane %v1448_v9, %v226_v28 }
 0x165   :  { %v160_v33 = vpop.xlane.xlu1 %159 }
 0x166   :  { %v166_v35 = vsub.f32 %v1461_v19, %v162_v32  ;;  %v165_v36 = vmul.f32 0.03125, %v160_v33  ;;  %v172_v43 = vmul.f32 %v168_v34, %v168_v34 }
 0x167   :  { %v154_v37 = vpop.xlane.xlu0 %153 }
 0x168   :  { %v163_v38 = vmul.f32 0.03125, %v154_v37  ;;  %v170_v39 = vmul.f32 %v166_v35, %v166_v35  ;;  %v169_v40 = vsub.f32 %v1465_v23, %v165_v36  ;;  %v180_v45 = vsel %vm148_vm1, %v172_v43, 0.0 }
 0x16a   :  { %v167_v41 = vsub.f32 %v1469_v26, %v163_v38  ;;  %v174_v42 = vsel %vm148_vm1, %v170_v39, 0.0  ;;  %v173_v47 = vmul.f32 %v169_v40, %v169_v40 }
 0x16b   :  { %175 = vadd.xlane.f32.xlu0 %v174_v42 }
 0x16c   :  { %v171_v44 = vmul.f32 %v167_v41, %v167_v41  ;;  %v183_v48 = vsel %vm148_vm1, %v173_v47, 0.0 }
 0x16e   :  { %v177_v46 = vsel %vm148_vm1, %v171_v44, 0.0 }
 0x16f   :  { %181 = vadd.xlane.f32.xlu0 %v180_v45  ;;  %178 = vadd.xlane.f32.xlu1 %v177_v46 }
 0x173   :  { %184 = vadd.xlane.f32.xlu1 %v183_v48 }
 0x1f4   :  { %v176_v51 = vpop.xlane.xlu0 %175 }
 0x1f5   :  { %v186_v52 = vmul.f32 0.03125, %v176_v51 }
 0x1f7   :  { %v190_v53 = vadd.f32 1e-05, %v186_v52 }
 0x1f8   :  { %v179_v54 = vpop.xlane.xlu1 %178  ;;  %v182_v55 = vpop.xlane.xlu0 %181 }
 0x1f9   :  { %1295 = vrsqrt.f32 %v190_v53  ;;  %v187_v56 = vmul.f32 0.03125, %v179_v54  ;;  %v188_v57 = vmul.f32 0.03125, %v182_v55 }
 0x1fb   :  { %v191_v58 = vadd.f32 1e-05, %v187_v56  ;;  %v192_v59 = vadd.f32 1e-05, %v188_v57 }
 0x1fc   :  { %v185_v60 = vpop.xlane.xlu1 %184 }
 0x1fd   :  { %1297 = vrsqrt.f32 %v191_v58  ;;  %v189_v61 = vmul.f32 0.03125, %v185_v60 }
 0x1fe   :  { %1299 = vrsqrt.f32 %v192_v59 }
 0x1ff   :  { %v193_v62 = vadd.f32 1e-05, %v189_v61 }
 0x201   :  { %1301 = vrsqrt.f32 %v193_v62 }
 0x206   :  { %v1296_v0 = vpop.eup %1295 }
 0x207   :  { %v198_v1 = vmul.f32 %v1296_v0, %v166_v35 }
 0x209   :  { %v206_v10 = vmul.f32 %v205_v2, %v198_v1 }
 0x20a   :  { %v1298_v4 = vpop.eup %1297 }
 0x20b   :  { %v1300_v5 = vpop.eup %1299  ;;  %v199_v6 = vmul.f32 %v1298_v4, %v167_v41  ;;  %v214_v16 = vadd.f32 %v213_v11, %v206_v10 }
 0x20c   :  { %v200_v12 = vmul.f32 %v1300_v5, %v168_v34 }
 0x20d   :  { %v207_v13 = vmul.f32 %v205_v2, %v199_v6 }
 0x20e   :  { %v1302_v14 = vpop.eup %1301  ;;  %v208_v20 = vmul.f32 %v205_v2, %v200_v12 }
 0x20f   :  { %v215_v17 = vadd.f32 %v213_v11, %v207_v13  ;;  %v201_v18 = vmul.f32 %v1302_v14, %v169_v40 }
 0x210   :  { %v216_v24 = vadd.f32 %v213_v11, %v208_v20 }
 0x211   :  { %v218_v21 = vpack.c.bf16 %v215_v17, %v214_v16  ;;  %v209_v22 = vmul.f32 %v205_v2, %v201_v18 }
 0x213   :  { %1208 = vmatprep.mubr.msk.bf16.mxu1 %vm148_vm1, %v218_v21  ;;  %v217_v25 = vadd.f32 %v213_v11, %v209_v22 }
 0x215   :  { %v219_v27 = vpack.c.bf16 %v217_v25, %v216_v24 }
 0x217   :  { %1209 = vmatmul.mubr.msk.bf16.vlgmr.msra.gmra.mxu1 %vm148_vm1, %v219_v27 }
 0x218   :  { %1214 = vmatprep.mubr.msk.bf16.mxu1 %vm1368_vm2, %v1367_v29 }
 0x2d7   :  { %v1210_v30 = vpop.f32.mrf.mxu1 }
 0x2d8   :  { %v289_v34 = vadd.f32 %v1210_v30, %v227_v31 }
 0x2d9   :  { %v280_v32 = vpop.f32.mrf.mxu1 }
 0x2da   :  { %v281_v37 = vadd.f32 %v280_v32, %v227_v31 }
 0x2db   :  { %v1211_v33 = vpop.f32.mrf.mxu1 }
 0x2dc   :  { %v292_v35 = vadd.f32 %v1211_v33, %v227_v31 }
 0x2dd   :  { %v283_v36 = vpop.f32.mrf.mxu1 }
 0x2de   :  { %v1509_v38 = vpack.c.bf16 %v292_v35, %v289_v34  ;;  %v284_v39 = vadd.f32 %v283_v36, %v227_v31 }
 0x2e0   :  { %v1511_v40 = vpack.c.bf16 %v284_v39, %v281_v37  ;;  %348 = vrot.lane.b32.xlu1 %v1509_v38, %s1369_s4 }
 0x2e2   :  { %298 = vrot.lane.b32.xlu0 %v1511_v40, %s1369_s4 }
 0x352   :  { %v349_v41 = vpop.permute.xlu1 %348 }
 0x353   :  { %v354_v42 = vsel %vm148_vm1, %v349_v41, 0 }
 0x354   :  { %1219 = vmatpush3.bf16.xpose.msra.mxu0 %v354_v42  ;;  %v299_v43 = vpop.permute.xlu0 %298 }
 0x355   :  { %v304_v44 = vsel %vm148_vm1, %v299_v43, 0  ;;  %1230 = vmatprep.subr.bf16.mxu0 %v1367_v29 }
 0x356   :  { %1213 = vmatpush3.bf16.xpose.msra.mxu1 %v304_v44  ;;  %v1285_v44 = vld [vmem:[%s1670_s5 + $0x8] sm:$0xff]  }
 0x357   :  { %1224 = vmatprep.subr.bf16.mxu1 %v1367_v29 }
 0x35b   :  { %1221 = vmatmul.mubr.msk.bf16.vlgmr.msra.gmra.mxu0 %vm148_vm1, %v1509_v38 }
 0x35c   :  { %1232 = vmatprep.mubr.msk.bf16.mxu0 %vm1368_vm2, %v1367_v29 }
 0x35d   :  { %1215 = vmatmul.mubr.msk.bf16.vlgmr.msra.gmra.mxu1 %vm148_vm1, %v1511_v40 }
 0x35e   :  { %1226 = vmatprep.mubr.msk.bf16.mxu1 %vm1368_vm2, %v1367_v29 }
 0x41b   :  { %v390_v45 = vpop.f32.mrf.mxu0 }
 0x41c   :  { %v399_v57 = vmul.f32 0.17677669, %v390_v45  ;;  %v1286_v45 = vld [vmem:[%s1670_s5] sm:$0xff]  }
 0x41d   :  { %v340_v46 = vpop.f32.mrf.mxu1  ;;  %v1222_v47 = vpop.f32.mrf.mxu0 }
 0x41e   :  { %v397_v48 = vmul.f32 0.17677669, %v340_v46  ;;  %v408_v60 = vsel %vm401_vm3, %v399_v57, -inf }
 0x41f   :  { %v1216_v49 = vpop.f32.mrf.mxu1  ;;  %v393_v50 = vpop.f32.mrf.mxu0 }
 0x420   :  { %v400_v51 = vmul.f32 0.17677669, %v393_v50  ;;  %v402_v52 = vsel %vm401_vm3, %v397_v48, -inf }
 0x421   :  { %v1223_v53 = vpop.f32.mrf.mxu0  ;;  %403 = vmax.xlane.f32.xlu1 %v402_v52  ;;  %v343_v54 = vpop.f32.mrf.mxu1 }
 0x422   :  { %v398_v55 = vmul.f32 0.17677669, %v343_v54  ;;  %v411_v58 = vsel %vm401_vm3, %v400_v51, -inf }
 0x423   :  { %v1217_v56 = vpop.f32.mrf.mxu1 }
 0x424   :  { %v405_v59 = vsel %vm401_vm3, %v398_v55, -inf  ;;  %v550_v56 = vsub.s32 4, %v1442_v7 }
 0x425   :  { %412 = vmax.xlane.f32.xlu1 %v411_v58  ;;  %406 = vmax.xlane.f32.xlu0 %v405_v59 }
 0x426   :  { %v551_v58 = vrot.slane %v1448_v9, %v550_v56 }
 0x429   :  { %409 = vmax.xlane.f32.xlu0 %v408_v60 }
 0x4aa   :  { %v404_v61 = vpop.xlane.xlu1 %403 }
 0x4ab   :  { %v414_v4 = vsub.f32 %v397_v48, %v404_v61 }
 0x4ad   :  { %v418_v12 = vmul.f32 1.442695, %v414_v4 }
 0x4ae   :  { %v413_v62 = vpop.xlane.xlu1 %412  ;;  %v407_v0 = vpop.xlane.xlu0 %406 }
 0x4af   :  { %v417_v1 = vsub.f32 %v400_v51, %v413_v62  ;;  %v415_v2 = vsub.f32 %v398_v55, %v407_v0 }
 0x4b1   :  { %v424_v5 = vmul.f32 1.442695, %v417_v1  ;;  %v420_v6 = vmul.f32 1.442695, %v415_v2 }
 0x4b2   :  { %v410_v10 = vpop.xlane.xlu0 %409 }
 0x4b3   :  { %1303 = vpow2.f32 %v424_v5  ;;  %v416_v11 = vsub.f32 %v399_v57, %v410_v10 }
 0x4b4   :  { %1305 = vpow2.f32 %v420_v6 }
 0x4b5   :  { %v422_v13 = vmul.f32 1.442695, %v416_v11 }
 0x4b7   :  { %1307 = vpow2.f32 %v422_v13 }
 0x4b8   :  { %1309 = vpow2.f32 %v418_v12 }
 0x4c0   :  { %v1304_v14 = vpop.eup %1303 }
 0x4c1   :  { %v435_v16 = vsel %vm401_vm3, %v1304_v14, 0.0  ;;  %v1306_v17 = vpop.eup %1305 }
 0x4c2   :  { %436 = vadd.xlane.f32.xlu1 %v435_v16  ;;  %v429_v20 = vsel %vm401_vm3, %v1306_v17, 0.0 }
 0x4c4   :  { %v1308_v18 = vpop.eup %1307 }
 0x4c5   :  { %v432_v21 = vsel %vm401_vm3, %v1308_v18, 0.0  ;;  %v1310_v22 = vpop.eup %1309 }
 0x4c6   :  { %430 = vadd.xlane.f32.xlu1 %v429_v20  ;;  %433 = vadd.xlane.f32.xlu0 %v432_v21  ;;  %v426_v24 = vsel %vm401_vm3, %v1310_v22, 0.0 }
 0x4ca   :  { %427 = vadd.xlane.f32.xlu0 %v426_v24 }
 0x4d7   :  { %495 = vrot.lane.b32.xlu1 %v1509_v38, %s1370_s28 }
 0x4e0   :  { %448 = vrot.lane.b32.xlu0 %v1511_v40, %s1370_s28 }
 0x54b   :  { %v437_v25 = vpop.xlane.xlu1 %436 }
 0x54c   :  { %1311 = vrcp.f32 %v437_v25 }
 0x54f   :  { %v431_v27 = vpop.xlane.xlu1 %430  ;;  %v434_v30 = vpop.xlane.xlu0 %433 }
 0x550   :  { %1313 = vrcp.f32 %v434_v30 }
 0x551   :  { %1315 = vrcp.f32 %v431_v27 }
 0x553   :  { %v496_v31 = vpop.permute.xlu1 %495  ;;  %v428_v32 = vpop.xlane.xlu0 %427 }
 0x554   :  { %1317 = vrcp.f32 %v428_v32  ;;  %1231 = vmatpush3.bf16.msra.mxu0 %v496_v31 }
 0x557   :  { %v449_v33 = vpop.permute.xlu0 %448 }
 0x558   :  { %1225 = vmatpush3.bf16.msra.mxu1 %v449_v33 }
 0x559   :  { %v1312_v34 = vpop.eup %1311  ;;  %1236 = vmatprep.subr.bf16.mxu1 %v1285_v44 }
 0x55a   :  { %v445_v39 = vmul.f32 %v1312_v34, %v1304_v14 }
 0x55d   :  { %v1314_v35 = vpop.eup %1313 }
 0x55e   :  { %v1316_v36 = vpop.eup %1315  ;;  %v444_v37 = vmul.f32 %v1314_v35, %v1308_v18 }
 0x55f   :  { %v443_v42 = vmul.f32 %v1316_v36, %v1306_v17 }
 0x560   :  { %v447_v41 = vpack.c.bf16 %v445_v39, %v444_v37  ;;  %v1287_v37 = vld [vmem:[%s1671_s6 + $0x8] sm:$0xff]   ;;  %v1288_v39 = vld [vmem:[%s1671_s6] sm:$0xff]  }
 0x561   :  { %v1318_v38 = vpop.eup %1317  ;;  %1244 = vmatprep.subr.bf16.mxu0 %v1287_v37 }
 0x562   :  { %v442_v40 = vmul.f32 %v1318_v38, %v1310_v22  ;;  %1233 = vmatmul.mubr.msk.bf16.vlgmr.msra.gmra.mxu0 %vm401_vm3, %v447_v41 }
 0x563   :  { %1245 = vmatpush3.bf16.msra.mxu0 %v1287_v37 }
 0x564   :  { %v446_v43 = vpack.c.bf16 %v443_v42, %v442_v40  ;;  %1246 = vmatprep.subr.bf16.mxu0 %v1288_v39 }
 0x566   :  { %1227 = vmatmul.mubr.msk.bf16.vlgmr.msra.gmra.mxu1 %vm401_vm3, %v446_v43 }
 0x567   :  { %1237 = vmatpush3.bf16.msra.mxu1 %v1285_v44  ;;  %1247 = vmatpush3.bf16.msra.mxu0 %v1288_v39 }
 0x568   :  { %1238 = vmatprep.subr.bf16.mxu1 %v1286_v45  ;;  %1264 = vmatprep.subr.bf16.mxu0 %v1367_v29 }
 0x56b   :  { %1239 = vmatpush3.bf16.msra.mxu1 %v1286_v45 }
 0x622   :  { %v535_v46 = vpop.f32.mrf.mxu0 }
 0x624   :  { %v1234_v47 = vpop.f32.mrf.mxu0 }
 0x626   :  { %v488_v48 = vpop.f32.mrf.mxu1  ;;  %v538_v49 = vpop.f32.mrf.mxu0 }
 0x627   :  { %v543_v54 = vpack.c.bf16 %v538_v49, %v535_v46 }
 0x628   :  { %v1228_v50 = vpop.f32.mrf.mxu1  ;;  %v1235_v51 = vpop.f32.mrf.mxu0 }
 0x629   :  { %v677_v51 = vsub.s32 5, %v1442_v7 }
 0x62a   :  { %v491_v52 = vpop.f32.mrf.mxu1 }
 0x62b   :  { %v542_v53 = vpack.c.bf16 %v491_v52, %v488_v48 }
 0x62c   :  { %v1229_v55 = vpop.f32.mrf.mxu1 }
 0x62d   :  { %1240 = vmatprep.mubr.msk.bf16.mxu1 %vm148_vm1, %v542_v53  ;;  %v685_v55 = vsub.s32 6, %v1442_v7 }
 0x62e   :  { %1241 = vmatmul.mubr.msk.bf16.vlgmr.msra.gmra.mxu1 %vm148_vm1, %v543_v54  ;;  %v678_v54 = vrot.slane %v1448_v9, %v677_v51 }
 0x6ee   :  { %v1242_v57 = vpop.f32.mrf.mxu1 }
 0x6ef   :  { %v613_v2 = vadd.f32 %v1242_v57, %v551_v58 }
 0x6f0   :  { %v604_v59 = vpop.f32.mrf.mxu1 }
 0x6f1   :  { %v605_v60 = vadd.f32 %v604_v59, %v551_v58  ;;  %v1563_v11 = vadd.f32 %v613_v2, %v1456_v15 }
 0x6f2   :  { %v1243_v61 = vpop.f32.mrf.mxu1 }
 0x6f3   :  { %v1552_v62 = vadd.f32 %v605_v60, %v1461_v19  ;;  %v616_v0 = vadd.f32 %v1243_v61, %v551_v58  ;;  %v686_v60 = vrot.slane %v1448_v9, %v685_v55 }
 0x6f4   :  { %v607_v1 = vpop.f32.mrf.mxu1 }
 0x6f5   :  { %v1555_v4 = vadd.f32 %v616_v0, %v1465_v23  ;;  %v608_v5 = vadd.f32 %v607_v1, %v551_v58  ;;  %v623_v6 = vsel %vm148_vm1, %v1552_v62, 0.0  ;;  %v629_v23 = vsel %vm148_vm1, %v1563_v11, 0.0 }
 0x6f6   :  { %624 = vadd.xlane.f32.xlu1 %v623_v6 }
 0x6f7   :  { %v1560_v10 = vadd.f32 %v608_v5, %v1469_v26  ;;  %v632_v12 = vsel %vm148_vm1, %v1555_v4, 0.0 }
 0x6f9   :  { %v626_v19 = vsel %vm148_vm1, %v1560_v10, 0.0 }
 0x6fa   :  { %627 = vadd.xlane.f32.xlu0 %v626_v19  ;;  %633 = vadd.xlane.f32.xlu1 %v632_v12 }
 0x6fe   :  { %630 = vadd.xlane.f32.xlu0 %v629_v23 }
 0x77f   :  { %v625_v13 = vpop.xlane.xlu1 %624 }
 0x780   :  { %v635_v14 = vmul.f32 0.03125, %v625_v13 }
 0x782   :  { %v639_v26 = vsub.f32 %v1552_v62, %v635_v14 }
 0x783   :  { %v628_v16 = vpop.xlane.xlu0 %627  ;;  %v634_v17 = vpop.xlane.xlu1 %633 }
 0x784   :  { %v636_v15 = vmul.f32 0.03125, %v628_v16  ;;  %v638_v18 = vmul.f32 0.03125, %v634_v17  ;;  %v643_v20 = vmul.f32 %v639_v26, %v639_v26  ;;  %v1289_v17 = vld [vmem:[%s1672_s7 + $0x18] sm:$0xff]  }
 0x785   :  { %1252 = vmatprep.subr.bf16.mxu1 %v1289_v17 }
 0x786   :  { %v640_v21 = vsub.f32 %v1560_v10, %v636_v15  ;;  %v642_v22 = vsub.f32 %v1555_v4, %v638_v18  ;;  %v647_v24 = vsel %vm148_vm1, %v643_v20, 0.0  ;;  %1253 = vmatpush3.bf16.msra.mxu1 %v1289_v17  ;;  %v1290_v15 = vld [vmem:[%s1672_s7 + $0x10] sm:$0xff]   ;;  %v1291_v18 = vld [vmem:[%s1672_s7 + $0x8] sm:$0xff]   ;;  %v1292_v20 = vld [vmem:[%s1672_s7] sm:$0xff]  }
 0x787   :  { %v631_v25 = vpop.xlane.xlu0 %630  ;;  %648 = vadd.xlane.f32.xlu0 %v647_v24  ;;  %1254 = vmatprep.subr.bf16.mxu1 %v1290_v15  ;;  %v1615_v17 = vld [vmem:[%s1667_s2 + $0x8] sm:$0xff] }
 0x788   :  { %v637_v27 = vmul.f32 0.03125, %v631_v25  ;;  %v644_v30 = vmul.f32 %v640_v21, %v640_v21  ;;  %v646_v33 = vmul.f32 %v642_v22, %v642_v22 }
 0x78a   :  { %v641_v31 = vsub.f32 %v1563_v11, %v637_v27  ;;  %v650_v32 = vsel %vm148_vm1, %v644_v30, 0.0  ;;  %v656_v36 = vsel %vm148_vm1, %v646_v33, 0.0  ;;  %1255 = vmatpush3.bf16.msra.mxu1 %v1290_v15  ;;  %v817_v15 = vrot.slane %v1615_v17, %v50_v8 }
 0x78b   :  { %651 = vadd.xlane.f32.xlu1 %v650_v32  ;;  %1256 = vmatprep.subr.bf16.mxu1 %v1291_v18 }
 0x78c   :  { %v645_v34 = vmul.f32 %v641_v31, %v641_v31 }
 0x78e   :  { %v653_v35 = vsel %vm148_vm1, %v645_v34, 0.0  ;;  %1257 = vmatpush3.bf16.msra.mxu1 %v1291_v18 }
 0x78f   :  { %654 = vadd.xlane.f32.xlu0 %v653_v35  ;;  %657 = vadd.xlane.f32.xlu1 %v656_v36 }
 0x790   :  { %1258 = vmatprep.subr.bf16.mxu1 %v1292_v20 }
 0x792   :  { %1259 = vmatpush3.bf16.msra.mxu1 %v1292_v20 }
 0x810   :  { %v649_v38 = vpop.xlane.xlu0 %648 }
 0x811   :  { %v659_v41 = vmul.f32 0.03125, %v649_v38 }
 0x813   :  { %v663_v40 = vadd.f32 1e-05, %v659_v41 }
 0x814   :  { %v652_v42 = vpop.xlane.xlu1 %651 }
 0x815   :  { %1319 = vrsqrt.f32 %v663_v40  ;;  %v660_v43 = vmul.f32 0.03125, %v652_v42 }
 0x817   :  { %v664_v44 = vadd.f32 1e-05, %v660_v43 }
 0x818   :  { %v655_v45 = vpop.xlane.xlu0 %654  ;;  %v658_v46 = vpop.xlane.xlu1 %657 }
 0x819   :  { %1321 = vrsqrt.f32 %v664_v44  ;;  %v661_v47 = vmul.f32 0.03125, %v655_v45  ;;  %v662_v48 = vmul.f32 0.03125, %v658_v46 }
 0x81b   :  { %v665_v49 = vadd.f32 1e-05, %v661_v47  ;;  %v666_v50 = vadd.f32 1e-05, %v662_v48 }
 0x81d   :  { %1323 = vrsqrt.f32 %v665_v49 }
 0x81e   :  { %1325 = vrsqrt.f32 %v666_v50 }
 0x822   :  { %v1320_v52 = vpop.eup %1319 }
 0x823   :  { %v671_v53 = vmul.f32 %v1320_v52, %v639_v26 }
 0x825   :  { %v679_v59 = vmul.f32 %v678_v54, %v671_v53 }
 0x826   :  { %v1322_v57 = vpop.eup %1321 }
 0x827   :  { %v672_v58 = vmul.f32 %v1322_v57, %v640_v21  ;;  %v687_v5 = vadd.f32 %v686_v60, %v679_v59  ;;  %v699_v21 = vsub.s32 7, %v1442_v7 }
 0x829   :  { %v680_v61 = vmul.f32 %v678_v54, %v672_v58 }
 0x82a   :  { %v1324_v0 = vpop.eup %1323 }
 0x82b   :  { %v1326_v1 = vpop.eup %1325  ;;  %v673_v2 = vmul.f32 %v1324_v0, %v641_v31  ;;  %v688_v6 = vadd.f32 %v686_v60, %v680_v61 }
 0x82c   :  { %v674_v19 = vmul.f32 %v1326_v1, %v642_v22  ;;  %v700_v22 = vrot.slane %v1448_v9, %v699_v21 }
 0x82d   :  { %v691_v12 = vpack.c.bf16 %v688_v6, %v687_v5  ;;  %v681_v23 = vmul.f32 %v678_v54, %v673_v2 }
 0x82e   :  { %v682_v13 = vmul.f32 %v678_v54, %v674_v19 }
 0x82f   :  { %1248 = vmatprep.mubr.msk.bf16.mxu0 %vm148_vm1, %v691_v12  ;;  %v689_v14 = vadd.f32 %v686_v60, %v681_v23 }
 0x830   :  { %v690_v26 = vadd.f32 %v686_v60, %v682_v13 }
 0x832   :  { %v692_v16 = vpack.c.bf16 %v690_v26, %v689_v14 }
 0x834   :  { %1249 = vmatmul.mubr.msk.bf16.vlgmr.msra.gmra.mxu0 %vm148_vm1, %v692_v16 }
 0x835   :  { %1268 = vmatprep.mubr.msk.bf16.mxu0 %vm1368_vm2, %v1367_v29 }
 0x8f4   :  { %v1250_v24 = vpop.f32.mrf.mxu0 }
 0x8f5   :  { %v762_v25 = vadd.f32 %v1250_v24, %v700_v22 }
 0x8f6   :  { %v753_v27 = vpop.f32.mrf.mxu0 }
 0x8f7   :  { %v770_v30 = vmul.f32 %v762_v25, %v762_v25  ;;  %v754_v31 = vadd.f32 %v753_v27, %v700_v22 }
 0x8f8   :  { %v1251_v32 = vpop.f32.mrf.mxu0 }
 0x8f9   :  { %v774_v33 = vmul.f32 %v770_v30, %v762_v25  ;;  %v768_v34 = vmul.f32 %v754_v31, %v754_v31  ;;  %v765_v35 = vadd.f32 %v1251_v32, %v700_v22 }
 0x8fa   :  { %v756_v36 = vpop.f32.mrf.mxu0 }
 0x8fb   :  { %v778_v37 = vmul.f32 0.044715, %v774_v33  ;;  %v772_v39 = vmul.f32 %v768_v34, %v754_v31  ;;  %v771_v38 = vmul.f32 %v765_v35, %v765_v35  ;;  %v757_v41 = vadd.f32 %v756_v36, %v700_v22 }
 0x8fd   :  { %v782_v40 = vadd.f32 %v778_v37, %v762_v25  ;;  %v776_v42 = vmul.f32 0.044715, %v772_v39  ;;  %v775_v43 = vmul.f32 %v771_v38, %v765_v35  ;;  %v769_v44 = vmul.f32 %v757_v41, %v757_v41 }
 0x8ff   :  { %v786_v45 = vmul.f32 0.7978846, %v782_v40  ;;  %v780_v9 = vadd.f32 %v776_v42, %v754_v31  ;;  %v779_v46 = vmul.f32 0.044715, %v775_v43  ;;  %v773_v47 = vmul.f32 %v769_v44, %v757_v41 }
 0x901   :  { %v784_v48 = vmul.f32 0.7978846, %v780_v9  ;;  %v783_v49 = vadd.f32 %v779_v46, %v765_v35  ;;  %v777_v50 = vmul.f32 0.044715, %v773_v47  ;;  %1327 = vtanh.f32 %v786_v45 }
 0x903   :  { %1329 = vtanh.f32 %v784_v48  ;;  %v787_v52 = vmul.f32 0.7978846, %v783_v49  ;;  %v781_v53 = vadd.f32 %v777_v50, %v757_v41 }
 0x905   :  { %1331 = vtanh.f32 %v787_v52  ;;  %v785_v54 = vmul.f32 0.7978846, %v781_v53 }
 0x907   :  { %1333 = vtanh.f32 %v785_v54 }
 0x90e   :  { %v1328_v55 = vpop.eup %1327 }
 0x90f   :  { %v794_v60 = vadd.f32 1.0, %v1328_v55 }
 0x910   :  { %v1330_v57 = vpop.eup %1329 }
 0x911   :  { %v792_v58 = vadd.f32 1.0, %v1330_v57  ;;  %v798_v6 = vmul.f32 0.5, %v794_v60 }
 0x912   :  { %v1332_v59 = vpop.eup %1331 }
 0x913   :  { %v795_v61 = vadd.f32 1.0, %v1332_v59  ;;  %v796_v1 = vmul.f32 0.5, %v792_v58  ;;  %v802_v14 = vmul.f32 %v798_v6, %v762_v25 }
 0x914   :  { %v1334_v0 = vpop.eup %1333 }
 0x915   :  { %v799_v2 = vmul.f32 0.5, %v795_v61  ;;  %v793_v5 = vadd.f32 1.0, %v1334_v0  ;;  %v800_v23 = vmul.f32 %v796_v1, %v754_v31 }
 0x917   :  { %v797_v19 = vmul.f32 0.5, %v793_v5  ;;  %v803_v12 = vmul.f32 %v799_v2, %v765_v35 }
 0x919   :  { %v801_v13 = vmul.f32 %v797_v19, %v757_v41  ;;  %v805_v16 = vpack.c.bf16 %v803_v12, %v802_v14  ;;  %v956_v19 = vrot.slane %v1615_v17, %v204_v63 }
 0x91b   :  { %v804_v26 = vpack.c.bf16 %v801_v13, %v800_v23  ;;  %v964_v23 = vrot.slane %v1615_v17, %v212_v3 }
 0x91d   :  { %1260 = vmatprep.mubr.msk.bf16.mxu1 %vm86_vm0, %v804_v26 }
 0x91e   :  { %1261 = vmatmul.mubr.msk.bf16.vlgmr.msra.gmra.mxu1 %vm86_vm0, %v805_v16 }
 0x9de   :  { %v1262_v18 = vpop.f32.mrf.mxu1 }
 0x9df   :  { %v891_v21 = vadd.f32 %v1262_v18, %v817_v15 }
 0x9e0   :  { %v882_v20 = vpop.f32.mrf.mxu1 }
 0x9e1   :  { %v883_v22 = vadd.f32 %v882_v20, %v817_v15  ;;  %v899_v33 = vadd.f32 %v891_v21, %v1563_v11 }
 0x9e2   :  { %v1263_v24 = vpop.f32.mrf.mxu1 }
 0x9e3   :  { %v897_v25 = vadd.f32 %v883_v22, %v1552_v62  ;;  %v894_v30 = vadd.f32 %v1263_v24, %v817_v15  ;;  %v907_v8 = vsel %vm148_vm1, %v899_v33, 0.0 }
 0x9e4   :  { %v885_v27 = vpop.f32.mrf.mxu1 }
 0x9e5   :  { %v886_v31 = vadd.f32 %v885_v27, %v817_v15  ;;  %v901_v32 = vsel %vm148_vm1, %v897_v25, 0.0  ;;  %v900_v36 = vadd.f32 %v894_v30, %v1555_v4 }
 0x9e6   :  { %902 = vadd.xlane.f32.xlu0 %v901_v32 }
 0x9e7   :  { %v898_v34 = vadd.f32 %v886_v31, %v1560_v10  ;;  %v910_v62 = vsel %vm148_vm1, %v900_v36, 0.0 }
 0x9e9   :  { %v904_v35 = vsel %vm148_vm1, %v898_v34, 0.0 }
 0x9ea   :  { %905 = vadd.xlane.f32.xlu1 %v904_v35  ;;  %908 = vadd.xlane.f32.xlu0 %v907_v8 }
 0x9ee   :  { %911 = vadd.xlane.f32.xlu1 %v910_v62 }
 0xa6f   :  { %v903_v37 = vpop.xlane.xlu0 %902 }
 0xa70   :  { %v913_v39 = vmul.f32 0.03125, %v903_v37 }
 0xa72   :  { %v917_v38 = vsub.f32 %v897_v25, %v913_v39 }
 0xa73   :  { %v906_v41 = vpop.xlane.xlu1 %905  ;;  %v909_v40 = vpop.xlane.xlu0 %908 }
 0xa74   :  { %v914_v11 = vmul.f32 0.03125, %v906_v41  ;;  %v915_v42 = vmul.f32 0.03125, %v909_v40  ;;  %v921_v43 = vmul.f32 %v917_v38, %v917_v38 }
 0xa76   :  { %v918_v10 = vsub.f32 %v898_v34, %v914_v11  ;;  %v919_v44 = vsub.f32 %v899_v33, %v915_v42  ;;  %v925_v45 = vsel %vm148_vm1, %v921_v43, 0.0 }
 0xa77   :  { %v912_v9 = vpop.xlane.xlu1 %911  ;;  %926 = vadd.xlane.f32.xlu0 %v925_v45 }
 0xa78   :  { %v916_v4 = vmul.f32 0.03125, %v912_v9  ;;  %v922_v46 = vmul.f32 %v918_v10, %v918_v10  ;;  %v923_v47 = vmul.f32 %v919_v44, %v919_v44 }
 0xa7a   :  { %v920_v48 = vsub.f32 %v900_v36, %v916_v4  ;;  %v928_v49 = vsel %vm148_vm1, %v922_v46, 0.0  ;;  %v931_v50 = vsel %vm148_vm1, %v923_v47, 0.0 }
 0xa7b   :  { %929 = vadd.xlane.f32.xlu1 %v928_v49  ;;  %932 = vadd.xlane.f32.xlu0 %v931_v50 }
 0xa7c   :  { %v924_v52 = vmul.f32 %v920_v48, %v920_v48 }
 0xa7e   :  { %v934_v53 = vsel %vm148_vm1, %v924_v52, 0.0 }
 0xa7f   :  { %935 = vadd.xlane.f32.xlu1 %v934_v53 }
 0xb00   :  { %v927_v54 = vpop.xlane.xlu0 %926 }
 0xb01   :  { %v937_v55 = vmul.f32 0.03125, %v927_v54 }
 0xb03   :  { %v941_v57 = vadd.f32 1e-05, %v937_v55 }
 0xb04   :  { %v930_v58 = vpop.xlane.xlu1 %929  ;;  %v933_v59 = vpop.xlane.xlu0 %932 }
 0xb05   :  { %1335 = vrsqrt.f32 %v941_v57  ;;  %v938_v60 = vmul.f32 0.03125, %v930_v58  ;;  %v939_v61 = vmul.f32 0.03125, %v933_v59  ;;  %v1293_v59 = vld [vmem:[%s1673_s8 + $0x8] sm:$0xff]  }
 0xb06   :  { %1265 = vmatpush3.bf16.msra.mxu0 %v1293_v59 }
 0xb07   :  { %v942_v0 = vadd.f32 1e-05, %v938_v60  ;;  %v943_v1 = vadd.f32 1e-05, %v939_v61  ;;  %v1294_v60 = vld [vmem:[%s1673_s8] sm:$0xff]   ;;  %1266 = vmatprep.subr.bf16.mxu0 %v1367_v29  ;;  %s1371_s8 = smov [#allocation2]  }
 0xb08   :  { %v936_v2 = vpop.xlane.xlu1 %935  ;;  %s1116_s24 = sshll.u32 %s1371_s8, 4  ;;  %s1117_s24 = int_to_ptr.vmem [resolvable:$true] %s1116_s24 }
 0xb09   :  { %1337 = vrsqrt.f32 %v942_v0  ;;  %v940_v5 = vmul.f32 0.03125, %v936_v2  ;;  %v1028_v2 = vrot.slane %v1615_v17, %v226_v28  ;;  %s1345_s1 = scalar_lea.vmem %s1117_s24, 32  ;;  %p1350_p1 = scmp.lt.s32.totalorder %s1117_s24, %s1117_s24 }
 0xb0a   :  { %1339 = vrsqrt.f32 %v943_v1  ;;  %1267 = vmatpush3.bf16.msra.mxu0 %v1294_v60  ;;  %p1346_p0 = scmp.ne.s32.totalorder %s1117_s24, %s1345_s1  ;;  %p1351_p2 = scmp.lt.s32.totalorder %s1345_s1, %s1345_s1 }
 0xb0b   :  { %v944_v6 = vadd.f32 1e-05, %v940_v5 }
 0xb0c   :  { %p1352_p3 = por %p1351_p2, %p1350_p1 }
 0xb0d   :  { %1341 = vrsqrt.f32 %v944_v6  ;;  %v1034_v6 = vrot.slane %v1615_v17, %v550_v56  ;;  %v1046_v56 = vrot.slane %v1615_v17, %v677_v51 }
 0xb0e   :  { %p1353_p4 = pnand %p1352_p3, %p1346_p0 }
 0xb12   :  { %v1336_v12 = vpop.eup %1335 }
 0xb13   :  { %v949_v13 = vmul.f32 %v1336_v12, %v917_v38 }
 0xb15   :  { %v957_v14 = vmul.f32 %v956_v19, %v949_v13 }
 0xb16   :  { %v1338_v26 = vpop.eup %1337 }
 0xb17   :  { %v1340_v16 = vpop.eup %1339  ;;  %v950_v15 = vmul.f32 %v1338_v26, %v918_v10  ;;  %v965_v18 = vadd.f32 %v964_v23, %v957_v14 }
 0xb18   :  { %v951_v20 = vmul.f32 %v1340_v16, %v919_v44 }
 0xb19   :  { %v958_v21 = vmul.f32 %v956_v19, %v950_v15  ;;  %v969_v63 = vsel %vm148_vm1, %v965_v18, 0.0 }
 0xb1a   :  { %v1342_v22 = vpop.eup %1341  ;;  %v959_v24 = vmul.f32 %v956_v19, %v951_v20 }
 0xb1b   :  { %v952_v25 = vmul.f32 %v1342_v22, %v920_v48  ;;  %v966_v27 = vadd.f32 %v964_v23, %v958_v21 }
 0xb1c   :  { %v967_v30 = vadd.f32 %v964_v23, %v959_v24 }
 0xb1d   :  { %v960_v31 = vmul.f32 %v956_v19, %v952_v25  ;;  %v970_v32 = vsel %vm148_vm1, %v966_v27, 0.0 }
 0xb1e   :  { %v971_v33 = vadd.f32 %v970_v32, %v969_v63  ;;  %v978_v35 = vsel %vm148_vm1, %v967_v30, 0.0 }
 0xb1f   :  { %v968_v3 = vadd.f32 %v964_v23, %v960_v31 }
 0xb20   :  { %v972_v34 = vrot.slane %v971_v33, 4 }
 0xb21   :  { %v979_v8 = vsel %vm148_vm1, %v968_v3, 0.0 }
 0xb22   :  { %v973_v36 = vadd.f32 %v972_v34, %v971_v33  ;;  %v980_v62 = vadd.f32 %v979_v8, %v978_v35 }
 0xb24   :  { %v974_v37 = vrot.slane %v973_v36, 2  ;;  %v981_v39 = vrot.slane %v980_v62, 4 }
 0xb26   :  { %v975_v38 = vadd.f32 %v974_v37, %v973_v36  ;;  %v982_v41 = vadd.f32 %v981_v39, %v980_v62 }
 0xb28   :  { %v976_v40 = vrot.slane %v975_v38, 1  ;;  %v983_v11 = vrot.slane %v982_v41, 2 }
 0xb2a   :  { %v984_v42 = vadd.f32 %v983_v11, %v982_v41  ;;  %v977_v43 = vadd.f32 %v976_v40, %v975_v38 }
 0xb2c   :  { %v985_v10 = vrot.slane %v984_v42, 1  ;;  %v988_v45 = vmul.f32 0.0625, %v977_v43 }
 0xb2e   :  { %v986_v44 = vadd.f32 %v985_v10, %v984_v42 }
 0xb30   :  { %v989_v9 = vmul.f32 0.0625, %v986_v44 }
 0xb32   :  { %v993_v4 = vsel %vm992_vm4, %v989_v9, %v988_v45 }
 0xb33   :  { %v996_v46 = vsel %vm995_vm5, %v993_v4, 0.0 }
 0xb34   :  { %997 = vadd.xlane.f32.xlu0 %v996_v46 }
 0xbbd   :  { %v998_v47 = vpop.xlane.xlu0 %997 }
 0xbbe   :  { %v999_v48 = vmul.f32 0.03125, %v998_v47 }
 0xbc0   :  { %v1001_v49 = vrot.slane %v999_v48, 1  ;;  %v1004_v50 = vsub.f32 %v988_v45, %v999_v48 }
 0xbc2   :  { %v1005_v52 = vsub.f32 %v989_v9, %v1001_v49  ;;  %v1006_v54 = vmul.f32 %v1004_v50, %v1004_v50 }
 0xbc4   :  { %v1007_v53 = vmul.f32 %v1005_v52, %v1005_v52 }
 0xbc6   :  { %v1010_v55 = vrot.slane %v1007_v53, 7 }
 0xbc8   :  { %v1011_v57 = vsel %vm992_vm4, %v1010_v55, %v1006_v54 }
 0xbc9   :  { %v1013_v58 = vsel %vm995_vm5, %v1011_v57, 0.0 }
 0xbca   :  { %1014 = vadd.xlane.f32.xlu1 %v1013_v58 }
 0xc53   :  { %v1015_v61 = vpop.xlane.xlu1 %1014 }
 0xc54   :  { %v1016_v0 = vmul.f32 0.03125, %v1015_v61 }
 0xc56   :  { %v1017_v1 = vadd.f32 1e-05, %v1016_v0 }
 0xc58   :  { %1343 = vrsqrt.f32 %v1017_v1 }
 0xc65   :  { %v1344_v5 = vpop.eup %1343 }
 0xc66   :  { %v1020_v19 = vrot.slane %v1344_v5, 1  ;;  %v1023_v12 = vmul.f32 %v1344_v5, %v1004_v50 }
 0xc68   :  { %v1024_v23 = vmul.f32 %v1020_v19, %v1005_v52  ;;  %v1029_v13 = vmul.f32 %v1028_v2, %v1023_v12 }
 0xc6a   :  { %v1030_v14 = vmul.f32 %v1028_v2, %v1024_v23  ;;  %v1035_v29 = vadd.f32 %v1034_v6, %v1029_v13 }
 0xc6c   :  { %v1036_v26 = vadd.f32 %v1034_v6, %v1030_v14  ;;  %v1037_v16 = vpack.c.bf16 %v1035_v29, %v1035_v29 }
 0xc6e   :  { %v1038_v15 = vpack.c.bf16 %v1036_v26, %v1036_v26  ;;  %v1049_v20 = vunpack.c.l.b16 %v1037_v16 }
 0xc70   :  { %v1050_v18 = vunpack.c.l.b16 %v1038_v15 }
 0xc72   :  { %v1051_v21 = vrot.slane %v1050_v18, 7 }
 0xc74   :  { %v1052_v22 = vsel %vm992_vm4, %v1051_v21, %v1049_v20 }
 0xc75   :  { %v1053_v28 = vpack.c.b16 %v1052_v22, %v1052_v22 }
 0xc77   :  { %1269 = vmatmul.mubr.msk.bf16.vlgmr.msra.gmra.mxu0 %vm148_vm1, %v1053_v28 }
 0xd37   :  { %v1103_v24 = vpop.f32.mrf.mxu0 }
 0xd38   :  { %v1104_v25 = vadd.f32 %v1103_v24, %v1046_v56 }
 0xd39   :  { %v1270_v27 = vpop.f32.mrf.mxu0 }
 0xd3a   :  { %1109 = vst [vmem:[#allocation2] sm:$0x3] %v1104_v25 }
 0xd3b   :  { %v1106_v30 = vpop.f32.mrf.mxu0 }
 0xd3c   :  { %1356 = shalt.err (!%p1353_p4)
}
 0xd3d   :  { %1119 = dma.vmem_to_hbm [thread:$0]  %s1117_s24, 32, %s1674_s9, [#allocation3]   ;;  %v1271_v7 = vpop.f32.mrf.mxu0 }
 0xd3e   :  { %1365 = dma.done.wait [#allocation3], 32  }
 0xd3f   :  { %1366 = vsyncadd [#allocation3], 4294967264 }
 0xd40   :  { %1123 = vsyncpa [#allocation3], 1 }

</bundles_post_ra>
